<compile_context>
chip_gen: v7x
topology: tpu7x:2x2x1
jax: 0.10.0
libtpu: 0.0.40
codegen_flags: <defaults>
</compile_context>

<pallas_src>
import functools

import numpy as np
import jax
import jax.numpy as jnp
from jax.experimental import pallas as pl
from jax.experimental.pallas import tpu as pltpu


# ----------------------------------------------------------------------------
# Fused Pallas kernel: mapping network -> spatial softmax -> NMS peak mask
# ----------------------------------------------------------------------------
def _fused_pose_head_kernel(x_ref, w1_ref, b1_ref, w2p_ref, b2p_ref,
                            w2f_ref, b2f_ref,
                            xhat_ref, paf_ref, mask_ref,
                            *, cin, width, hw, thr_abs, thr_rel):
    xx = x_ref[0]                                                   # (Cin, HW)

    # ---- 1x1-conv MLP; HW stays on the lane axis the whole way ----
    if cin == 1:
        # K == 1: a "matmul" is just an outer product; do it as a VPU broadcast mul-add.
        h = w1_ref[...] * xx + b1_ref[...]                          # (Hid,1)*(1,HW) -> (Hid,HW)
    else:
        h = jnp.dot(w1_ref[...], xx, preferred_element_type=jnp.float32) + b1_ref[...]
    h = jnp.maximum(h, 0.0)                                         # ReLU

    pose = jnp.dot(w2p_ref[...], h, preferred_element_type=jnp.float32) + b2p_ref[...]  # (S, HW)
    paf_ref[0] = jnp.dot(w2f_ref[...], h, preferred_element_type=jnp.float32) + b2f_ref[...]

    # ---- spatial softmax over HW per channel (_normalize_softmax) ----
    m = jnp.max(pose, axis=-1, keepdims=True)                       # (S, 1)
    e = jnp.exp(pose - m)
    s = jnp.sum(e, axis=-1, keepdims=True)
    inv = pl.reciprocal(s, approx=True)                             # EUP slot, ~free next to exp
    xh = e * inv                                                    # softmax output (S, HW)
    xhat_ref[0] = xh
    # per-channel max of the softmax output is exactly `inv` (exp(0) * inv),
    # so no second max-reduction is needed for the relative threshold.

    # ---- BeliveMapsNMS: 3x3 max-pool (stride 1, pad 1) in flattened layout ----
    idx = jax.lax.broadcasted_iota(jnp.int32, xh.shape, 1)
    col = idx % width
    neg_inf = -jnp.inf
    left = jnp.where(col == 0, neg_inf, pltpu.roll(xh, 1, axis=1))
    right = jnp.where(col == width - 1, neg_inf, pltpu.roll(xh, hw - 1, axis=1))
    row_max = jnp.maximum(jnp.maximum(xh, left), right)
    up = jnp.where(idx < width, neg_inf, pltpu.roll(row_max, width, axis=1))
    down = jnp.where(idx >= hw - width, neg_inf, pltpu.roll(row_max, hw - width, axis=1))
    x_max = jnp.maximum(jnp.maximum(row_max, up), down)             # 3x3 neighbourhood max

    peaks = (x_max == xh) & (xh > thr_abs)
    if thr_rel is not None:
        peaks = peaks & (xh > thr_rel * inv)
    mask_ref[0] = peaks.astype(jnp.int8)                            # int8: 4x less writeback/D2H


def pose_head_fused(x, w1, b1, w2, b2, *, n_segments, n_affinity_maps,
                    threshold_abs=0, threshold_rel=0.01, min_distance=1):
    """x: (B, Cin, H, W) f32 -> (xhat (B,S,H,W), PAFs (B,A,2,H,W), peak mask int8 (B,S,H,W))."""
    B, Cin, H, W = x.shape
    HW = H * W
    Hid = w1.shape[0]
    S = n_segments
    A2 = 2 * n_affinity_maps
    assert w2.shape[0] == S + A2
    # TODO(synk): only min_distance == 1 (3x3 NMS window) is implemented in the kernel.
    assert min_distance == 1
    # TODO(synk): the flattened roll-based max-pool assumes H*W is a multiple of 128 (lane width);
    #             for larger images also add an HW tile axis / online softmax to bound VMEM.
    if threshold_abs == 0:
        threshold_abs = 1.0 / (H * W) * 2
    thr_abs = float(threshold_abs)
    thr_rel = None if threshold_rel is None else float(threshold_rel)

    xf = x.reshape(B, Cin, HW)
    # split the output projection on the host side so the kernel writes pose / PAF channels
    # directly to two lane-dense outputs (no in-kernel odd-offset sublane slicing).
    w2p, w2f = w2[:S], w2[S:]
    b2p, b2f = b2[:S], b2[S:]

    kernel = functools.partial(
        _fused_pose_head_kernel, cin=Cin, width=W, hw=HW, thr_abs=thr_abs, thr_rel=thr_rel)

    xhat, paf, mask = pl.pallas_call(
        kernel,
        out_shape=(
            jax.ShapeDtypeStruct((B, S, HW), jnp.float32),
            jax.ShapeDtypeStruct((B, A2, HW), jnp.float32),
            jax.ShapeDtypeStruct((B, S, HW), jnp.int8),
        ),
        grid=(B,),
        in_specs=[
            pl.BlockSpec((1, Cin, HW), lambda b: (b, 0, 0)),
            pl.BlockSpec((Hid, Cin), lambda b: (0, 0)),
            pl.BlockSpec((Hid, 1), lambda b: (0, 0)),
            pl.BlockSpec((S, Hid), lambda b: (0, 0)),
            pl.BlockSpec((S, 1), lambda b: (0, 0)),
            pl.BlockSpec((A2, Hid), lambda b: (0, 0)),
            pl.BlockSpec((A2, 1), lambda b: (0, 0)),
        ],
        out_specs=(
            pl.BlockSpec((1, S, HW), lambda b: (b, 0, 0)),
            pl.BlockSpec((1, A2, HW), lambda b: (b, 0, 0)),
            pl.BlockSpec((1, S, HW), lambda b: (b, 0, 0)),
        ),
        compiler_params=pltpu.CompilerParams(
            dimension_semantics=("parallel",),
            vmem_limit_bytes=48 * 1024 * 1024,      # safe on v5e/v6e (128 MiB) and v7x (64 MiB)
        ),
    )(xf, w1, b1, w2p, b2p, w2f, b2f)

    return (xhat.reshape(B, S, H, W),
            paf.reshape(B, n_affinity_maps, 2, H, W),
            mask.reshape(B, S, H, W))


# ----------------------------------------------------------------------------
# Host-side glue: peak extraction (nonzero / per-segment topk) — dynamic shapes
# ----------------------------------------------------------------------------
def nms_host(xhat_np, mask_np, max_num_peaks, S):
    # TODO(synk): could be moved on-device with a fixed-K top-k, but exact parity with the torch
    #             module's "keep all peaks unless count > max_num_peaks*S" + nonzero ordering
    #             requires the data-dependent host path.
    outputs = []
    for b in range(xhat_np.shape[0]):
        xi = xhat_np[b]
        xm = mask_np[b].astype(bool)
        ind = np.argwhere(xm)                       # (N, 3): (seg, row, col)
        skeletons = ind[:, [0, 2, 1]]               # (seg, x, y)
        scores_abs = xi[ind[:, 0], ind[:, 1], ind[:, 2]]
        if ind.shape[0] > max_num_peaks * S:
            sc_l, sk_l = [], []
            for n_seg in range(S):
                valid = ind[:, 0] == n_seg
                _scores = scores_abs[valid]
                if len(_scores):
                    k = min(max_num_peaks, len(_scores))
                    iis = np.argsort(-_scores)[:k]
                    sc_l.append(_scores[iis])
                    sk_l.append(skeletons[valid][iis])
            scores_abs = np.concatenate(sc_l)
            skeletons = np.concatenate(sk_l)
        outputs.append((skeletons, scores_abs))
    return outputs


# ----------------------------------------------------------------------------
# Host-side glue: PAFWeighter — data-dependent edge construction (numpy)
# ----------------------------------------------------------------------------
def paf_weighter_host(skeletons, PAF, n_segments, keypoint_max_dist=20,
                      PAF_seg_dist=1, n_points_integral=10):
    if len(skeletons) == 0:
        return (np.zeros((0, 2), dtype=skeletons.dtype),
                np.zeros((0, 2), dtype=np.float32))
    n_affinity_maps = PAF.shape[0]
    seg_inds = skeletons[:, 0]
    skels_xy = skeletons[:, 1:]
    skels_inds = np.arange(len(skeletons))
    groups = []
    for ii in range(n_segments):
        good = seg_inds == ii
        groups.append((skels_inds[good], skels_xy[good]))

    N = n_points_integral - 1
    edges_idx, edges_cost = [], []
    for i1 in range(n_affinity_maps):
        i2 = i1 + PAF_seg_dist
        p1_ind, p1_l = groups[i1]
        p2_ind, p2_l = groups[i2]
        n_p1, n_p2 = len(p1_l), len(p2_l)
        p1 = np.broadcast_to(p1_l[None], (n_p2, n_p1, 2))
        p2 = np.broadcast_to(p2_l[:, None], (n_p2, n_p1, 2))
        inds = np.stack([(p1 * (N - x) + p2 * x) // N for x in range(n_points_integral)])
        paf_vals = PAF[i1][:, inds[..., 1], inds[..., 0]]          # (2, n_pts, n_p2, n_p1)
        p1_f, p2_f = p1.astype(np.float32), p2.astype(np.float32)
        target_v = p2_f - p1_f
        R = np.sqrt((target_v ** 2).sum(axis=2))                   # (n_p2, n_p1)
        with np.errstate(divide='ignore', invalid='ignore'):
            target_v = target_v / R[..., None]
        target_v = np.transpose(target_v, (2, 0, 1))               # (2, n_p2, n_p1)
        line_integral = (target_v[:, None] * paf_vals).sum(axis=0).mean(axis=0)
        pairs = np.nonzero(R < keypoint_max_dist)
        pv = line_integral[pairs[0], pairs[1]]
        pv = np.where(np.isnan(pv), 0.0, pv)
        R_vals = R[pairs[0], pairs[1]]
        points_pairs = np.stack((p1_ind[pairs[1]], p2_ind[pairs[0]]))
        costs = np.stack((pv, R_vals))
        edges_idx.append(points_pairs)
        edges_cost.append(costs)
    edges_indices = np.concatenate(edges_idx, axis=1)
    edges_costs = np.concatenate(edges_cost, axis=1)
    return edges_indices, edges_costs


# ----------------------------------------------------------------------------
# PoseDetector.forward (eval mode, targets=None, return_belive_maps=True)
# ----------------------------------------------------------------------------
def pose_detector_forward(x, w1, b1, w2, b2, *, n_segments, n_affinity_maps,
                          nms_threshold_abs=0, nms_threshold_rel=0.01,
                          nms_min_distance=1, max_poses=100, keypoint_max_dist=20):
    xhat, PAFs, mask = pose_head_fused(
        x, w1, b1, w2, b2,
        n_segments=n_segments, n_affinity_maps=n_affinity_maps,
        threshold_abs=nms_threshold_abs, threshold_rel=nms_threshold_rel,
        min_distance=nms_min_distance)

    jax.block_until_ready((xhat, PAFs, mask))
    xhat_np = np.asarray(xhat)
    mask_np = np.asarray(mask)
    PAFs_np = np.asarray(PAFs)

    outs = nms_host(xhat_np, mask_np, max_poses, n_segments)
    result = []
    for (skeletons, scores_abs), PAF in zip(outs, PAFs_np):
        edges_indices, edges_costs = paf_weighter_host(
            skeletons, PAF, n_segments, keypoint_max_dist=keypoint_max_dist)
        result.append(dict(skeletons=skeletons, scores_abs=scores_abs,
                           edges_indices=edges_indices, edges_costs=edges_costs))
    # eval mode, targets=None -> outputs == [result]; belive maps as the optional extra
    return result, (xhat, PAFs)


# ----------------------------------------------------------------------------
# Pure-JAX / numpy references for correctness checking
# ----------------------------------------------------------------------------
def _reference_maps(x, w1, b1, w2, b2, n_segments, n_affinity_maps):
    B, Cin, H, W = x.shape
    S = n_segments
    hp = jax.lax.Precision.HIGHEST
    xf = x.reshape(B, Cin, H * W)
    h = jnp.maximum(jnp.einsum("hc,bcp->bhp", w1, xf, precision=hp) + b1[None], 0.0)
    o = jnp.einsum("oh,bhp->bop", w2, h, precision=hp) + b2[None]
    pose, paf = o[:, :S], o[:, S:]
    e = jnp.exp(pose - pose.max(axis=-1, keepdims=True))
    xhat = e / e.sum(axis=-1, keepdims=True)
    return (xhat.reshape(B, S, H, W),
            paf.reshape(B, n_affinity_maps, 2, H, W))


def _reference_mask(xhat_np, thr_abs, thr_rel):
    B, S, H, W = xhat_np.shape
    pad = np.pad(xhat_np, ((0, 0), (0, 0), (1, 1), (1, 1)), constant_values=-np.inf)
    shifts = [pad[:, :, 1 + dy:1 + dy + H, 1 + dx:1 + dx + W]
              for dy in (-1, 0, 1) for dx in (-1, 0, 1)]
    x_max = np.max(np.stack(shifts), axis=0)
    m = (x_max == xhat_np) & (xhat_np > np.float32(thr_abs))
    if thr_rel is not None:
        vmax = xhat_np.max(axis=(2, 3), keepdims=True)
        m &= xhat_np > np.float32(thr_rel) * vmax
    return m


if __name__ == "__main__":
    # Small, module-consistent shapes (PoseDetector default n_inputs=1).
    B, Cin, H, W = 2, 1, 16, 16
    n_segments, n_affinity_maps = 5, 4
    hidden = 32
    Cout = n_segments + 2 * n_affinity_maps

    key = jax.random.PRNGKey(0)
    k1, k2, k3, k4, k5 = jax.random.split(key, 5)
    x = jax.random.normal(k1, (B, Cin, H, W), dtype=jnp.float32)
    w1 = 0.5 * jax.random.normal(k2, (hidden, Cin), dtype=jnp.float32)
    b1 = 0.1 * jax.random.normal(k3, (hidden, 1), dtype=jnp.float32)
    w2 = 0.5 * jax.random.normal(k4, (Cout, hidden), dtype=jnp.float32)
    b2 = 0.1 * jax.random.normal(k5, (Cout, 1), dtype=jnp.float32)

    # --- kernel vs pure-JAX reference (belive maps + peak mask) ---
    xhat_k, paf_k, mask_k = pose_head_fused(
        x, w1, b1, w2, b2,
        n_segments=n_segments, n_affinity_maps=n_affinity_maps,
        threshold_abs=0, threshold_rel=0.01, min_distance=1)
    jax.block_until_ready((xhat_k, paf_k, mask_k))

    xhat_ref, paf_ref = _reference_maps(x, w1, b1, w2, b2, n_segments, n_affinity_maps)
    np.testing.assert_allclose(np.asarray(xhat_k), np.asarray(xhat_ref), rtol=2e-2, atol=1e-6)
    np.testing.assert_allclose(np.asarray(paf_k), np.asarray(paf_ref), rtol=2e-2, atol=2e-2)

    thr_abs = 1.0 / (H * W) * 2
    mask_exp = _reference_mask(np.asarray(xhat_k), thr_abs, 0.01)
    assert np.array_equal(np.asarray(mask_k).astype(bool), mask_exp)

    # --- full forward pass (eval mode) ---
    result, (xhat, PAFs) = pose_detector_forward(
        x, w1, b1, w2, b2,
        n_segments=n_segments, n_affinity_maps=n_affinity_maps,
        nms_threshold_abs=0, nms_threshold_rel=0.01,
        nms_min_distance=1, max_poses=100, keypoint_max_dist=20)
    jax.block_until_ready((xhat, PAFs))

    assert len(result) == B
    for r in result:
        assert set(r.keys()) == {"skeletons", "scores_abs", "edges_indices", "edges_costs"}
    print("KERNEL_OK")
</pallas_src>

<mosaic_0001>
module attributes {stable_mosaic.version = 11 : i64} {
  func.func @_fused_pose_head_kernel(%arg0: i32, %arg1: memref<1x1x256xf32, #tpu.memory_space<vmem>>, %arg2: memref<32x1xf32, #tpu.memory_space<vmem>>, %arg3: memref<32x1xf32, #tpu.memory_space<vmem>>, %arg4: memref<5x32xf32, #tpu.memory_space<vmem>>, %arg5: memref<5x1xf32, #tpu.memory_space<vmem>>, %arg6: memref<8x32xf32, #tpu.memory_space<vmem>>, %arg7: memref<8x1xf32, #tpu.memory_space<vmem>>, %arg8: memref<1x5x256xf32, #tpu.memory_space<vmem>>, %arg9: memref<1x8x256xf32, #tpu.memory_space<vmem>>, %arg10: memref<1x5x256xi8, #tpu.memory_space<vmem>>) attributes {dimension_semantics = [#tpu.dimension_semantics<parallel>], iteration_bounds = array<i64: 2>, scalar_prefetch = 0 : i64, scratch_operands = 0 : i64, tpu.core_type = #tpu.core_type<tc>, window_params = [{transform_indices = @transform_0, window_bounds = array<i64: 1, 1, 256>}, {pipeline_mode = #tpu.pipeline_mode<synchronous>, transform_indices = @transform_1, window_bounds = array<i64: 32, 1>}, {pipeline_mode = #tpu.pipeline_mode<synchronous>, transform_indices = @transform_2, window_bounds = array<i64: 32, 1>}, {pipeline_mode = #tpu.pipeline_mode<synchronous>, transform_indices = @transform_3, window_bounds = array<i64: 5, 32>}, {pipeline_mode = #tpu.pipeline_mode<synchronous>, transform_indices = @transform_4, window_bounds = array<i64: 5, 1>}, {pipeline_mode = #tpu.pipeline_mode<synchronous>, transform_indices = @transform_5, window_bounds = array<i64: 8, 32>}, {pipeline_mode = #tpu.pipeline_mode<synchronous>, transform_indices = @transform_6, window_bounds = array<i64: 8, 1>}, {transform_indices = @transform_7, window_bounds = array<i64: 1, 5, 256>}, {transform_indices = @transform_8, window_bounds = array<i64: 1, 8, 256>}, {transform_indices = @transform_9, window_bounds = array<i64: 1, 5, 256>}]} {
    %c0 = arith.constant 0 : index
    %c0_0 = arith.constant 0 : index
    %c0_1 = arith.constant 0 : index
    %0 = vector.load %arg1[%c0, %c0_0, %c0_1] : memref<1x1x256xf32, #tpu.memory_space<vmem>>, vector<1x1x256xf32>
    %1 = vector.shape_cast %0 : vector<1x1x256xf32> to vector<1x256xf32>
    %c0_2 = arith.constant 0 : index
    %c0_3 = arith.constant 0 : index
    %2 = vector.load %arg2[%c0_2, %c0_3] : memref<32x1xf32, #tpu.memory_space<vmem>>, vector<32x1xf32>
    %3 = vector.broadcast %2 : vector<32x1xf32> to vector<32x256xf32>
    %4 = vector.broadcast %1 : vector<1x256xf32> to vector<32x256xf32>
    %5 = arith.mulf %3, %4 : vector<32x256xf32>
    %c0_4 = arith.constant 0 : index
    %c0_5 = arith.constant 0 : index
    %6 = vector.load %arg3[%c0_4, %c0_5] : memref<32x1xf32, #tpu.memory_space<vmem>>, vector<32x1xf32>
    %7 = vector.broadcast %6 : vector<32x1xf32> to vector<32x256xf32>
    %8 = arith.addf %5, %7 : vector<32x256xf32>
    %cst = arith.constant 0.000000e+00 : f32
    %9 = vector.broadcast %cst : f32 to vector<32x256xf32>
    %10 = arith.maximumf %8, %9 : vector<32x256xf32>
    %c0_6 = arith.constant 0 : index
    %c0_7 = arith.constant 0 : index
    %11 = vector.load %arg4[%c0_6, %c0_7] : memref<5x32xf32, #tpu.memory_space<vmem>>, vector<5x32xf32>
    %cst_8 = arith.constant dense<0.000000e+00> : vector<5x256xf32>
    %12 = tpu.matmul %11, %10, %cst_8 {dimension_numbers = #tpu.dot_dimension_numbers<[1], [0], [0], [1], [0, 0, 1, 1], [], []>} : vector<5x32xf32>, vector<32x256xf32>, vector<5x256xf32> -> vector<5x256xf32>
    %c0_9 = arith.constant 0 : index
    %c0_10 = arith.constant 0 : index
    %13 = vector.load %arg5[%c0_9, %c0_10] : memref<5x1xf32, #tpu.memory_space<vmem>>, vector<5x1xf32>
    %14 = vector.broadcast %13 : vector<5x1xf32> to vector<5x256xf32>
    %15 = arith.addf %12, %14 : vector<5x256xf32>
    %c0_11 = arith.constant 0 : index
    %c0_12 = arith.constant 0 : index
    %16 = vector.load %arg6[%c0_11, %c0_12] : memref<8x32xf32, #tpu.memory_space<vmem>>, vector<8x32xf32>
    %cst_13 = arith.constant dense<0.000000e+00> : vector<8x256xf32>
    %17 = tpu.matmul %16, %10, %cst_13 {dimension_numbers = #tpu.dot_dimension_numbers<[1], [0], [0], [1], [0, 0, 1, 1], [], []>} : vector<8x32xf32>, vector<32x256xf32>, vector<8x256xf32> -> vector<8x256xf32>
    %c0_14 = arith.constant 0 : index
    %c0_15 = arith.constant 0 : index
    %18 = vector.load %arg7[%c0_14, %c0_15] : memref<8x1xf32, #tpu.memory_space<vmem>>, vector<8x1xf32>
    %19 = vector.broadcast %18 : vector<8x1xf32> to vector<8x256xf32>
    %20 = arith.addf %17, %19 : vector<8x256xf32>
    %c0_16 = arith.constant 0 : index
    %c0_17 = arith.constant 0 : index
    %c0_18 = arith.constant 0 : index
    %21 = vector.load %arg9[%c0_16, %c0_17, %c0_18] : memref<1x8x256xf32, #tpu.memory_space<vmem>>, vector<1x8x256xf32>
    %22 = vector.shape_cast %21 : vector<1x8x256xf32> to vector<8x256xf32>
    %23 = vector.shape_cast %20 : vector<8x256xf32> to vector<1x8x256xf32>
    tpu.vector_store %arg9[%c0_16, %c0_17, %c0_18], %23 {strides = array<i32>} : memref<1x8x256xf32, #tpu.memory_space<vmem>>, vector<1x8x256xf32>,
    %cst_19 = arith.constant dense<0xFF800000> : vector<5xf32>
    %24 = vector.multi_reduction <maximumf>, %15, %cst_19 [1] : vector<5x256xf32> to vector<5xf32>
    %25 = vector.shape_cast %24 : vector<5xf32> to vector<5x1xf32>
    %26 = vector.broadcast %25 : vector<5x1xf32> to vector<5x256xf32>
    %27 = arith.subf %15, %26 : vector<5x256xf32>
    %28 = math.exp %27 : vector<5x256xf32>
    %cst_20 = arith.constant dense<0.000000e+00> : vector<5xf32>
    %29 = vector.multi_reduction <add>, %28, %cst_20 [1] : vector<5x256xf32> to vector<5xf32>
    %30 = vector.shape_cast %29 : vector<5xf32> to vector<5x1xf32>
    %31 = tpu.reciprocal %30 {approx = true} : vector<5x1xf32> -> vector<5x1xf32>
    %32 = vector.broadcast %31 : vector<5x1xf32> to vector<5x256xf32>
    %33 = arith.mulf %28, %32 : vector<5x256xf32>
    %c0_21 = arith.constant 0 : index
    %c0_22 = arith.constant 0 : index
    %c0_23 = arith.constant 0 : index
    %34 = vector.load %arg8[%c0_21, %c0_22, %c0_23] : memref<1x5x256xf32, #tpu.memory_space<vmem>>, vector<1x5x256xf32>
    %35 = vector.shape_cast %34 : vector<1x5x256xf32> to vector<5x256xf32>
    %36 = vector.shape_cast %33 : vector<5x256xf32> to vector<1x5x256xf32>
    tpu.vector_store %arg8[%c0_21, %c0_22, %c0_23], %36 {strides = array<i32>} : memref<1x5x256xf32, #tpu.memory_space<vmem>>, vector<1x5x256xf32>,
    %37 = tpu.iota {dimensions = array<i32: 1>} : vector<5x256xi32>
    %c16_i32 = arith.constant 16 : i32
    %c0_i32 = arith.constant 0 : i32
    %38 = arith.cmpi eq, %c16_i32, %c0_i32 : i32
    %c1_i32 = arith.constant 1 : i32
    %39 = arith.select %38, %c1_i32, %c16_i32 : i32
    %40 = vector.broadcast %39 : i32 to vector<5x256xi32>
    %41 = arith.remsi %37, %40 : vector<5x256xi32>
    %c0_i32_24 = arith.constant 0 : i32
    %42 = vector.broadcast %c0_i32_24 : i32 to vector<5x256xi32>
    %43 = arith.cmpi ne, %41, %42 : vector<5x256xi32>
    %c0_i32_25 = arith.constant 0 : i32
    %44 = vector.broadcast %c0_i32_25 : i32 to vector<5x256xi32>
    %45 = arith.cmpi slt, %41, %44 : vector<5x256xi32>
    %c0_i32_26 = arith.constant 0 : i32
    %46 = arith.cmpi slt, %39, %c0_i32_26 : i32
    %47 = vector.broadcast %46 : i1 to vector<5x256xi1>
    %48 = vector.broadcast %47 : vector<5x256xi1> to vector<5x256xi1>
    %49 = arith.xori %45, %48 : vector<5x256xi1>
    %50 = arith.andi %49, %43 : vector<5x256xi1>
    %51 = vector.broadcast %39 : i32 to vector<5x256xi32>
    %52 = arith.addi %41, %51 : vector<5x256xi32>
    %53 = arith.select %50, %52, %41 : vector<5x256xi1>, vector<5x256xi32>
    %c0_i32_27 = arith.constant 0 : i32
    %54 = vector.broadcast %c0_i32_27 : i32 to vector<5x256xi32>
    %55 = arith.cmpi eq, %53, %54 : vector<5x256xi32>
    %c1_i32_28 = arith.constant 1 : i32
    %56 = tpu.dynamic_rotate %33 by %c1_i32_28 dim 1 : vector<5x256xf32>, i32 -> vector<5x256xf32>
    %cst_29 = arith.constant 0xFF800000 : f32
    %57 = vector.broadcast %cst_29 : f32 to vector<5x256xf32>
    %58 = arith.select %55, %57, %56 : vector<5x256xi1>, vector<5x256xf32>
    %c15_i32 = arith.constant 15 : i32
    %59 = vector.broadcast %c15_i32 : i32 to vector<5x256xi32>
    %60 = arith.cmpi eq, %53, %59 : vector<5x256xi32>
    %c255_i32 = arith.constant 255 : i32
    %61 = tpu.dynamic_rotate %33 by %c255_i32 dim 1 : vector<5x256xf32>, i32 -> vector<5x256xf32>
    %cst_30 = arith.constant 0xFF800000 : f32
    %62 = vector.broadcast %cst_30 : f32 to vector<5x256xf32>
    %63 = arith.select %60, %62, %61 : vector<5x256xi1>, vector<5x256xf32>
    %64 = arith.maximumf %33, %58 : vector<5x256xf32>
    %65 = arith.maximumf %64, %63 : vector<5x256xf32>
    %c16_i32_31 = arith.constant 16 : i32
    %66 = vector.broadcast %c16_i32_31 : i32 to vector<5x256xi32>
    %67 = arith.cmpi slt, %37, %66 : vector<5x256xi32>
    %c16_i32_32 = arith.constant 16 : i32
    %68 = tpu.dynamic_rotate %65 by %c16_i32_32 dim 1 : vector<5x256xf32>, i32 -> vector<5x256xf32>
    %cst_33 = arith.constant 0xFF800000 : f32
    %69 = vector.broadcast %cst_33 : f32 to vector<5x256xf32>
    %70 = arith.select %67, %69, %68 : vector<5x256xi1>, vector<5x256xf32>
    %c240_i32 = arith.constant 240 : i32
    %71 = vector.broadcast %c240_i32 : i32 to vector<5x256xi32>
    %72 = arith.cmpi sge, %37, %71 : vector<5x256xi32>
    %c240_i32_34 = arith.constant 240 : i32
    %73 = tpu.dynamic_rotate %65 by %c240_i32_34 dim 1 : vector<5x256xf32>, i32 -> vector<5x256xf32>
    %cst_35 = arith.constant 0xFF800000 : f32
    %74 = vector.broadcast %cst_35 : f32 to vector<5x256xf32>
    %75 = arith.select %72, %74, %73 : vector<5x256xi1>, vector<5x256xf32>
    %76 = arith.maximumf %65, %70 : vector<5x256xf32>
    %77 = arith.maximumf %76, %75 : vector<5x256xf32>
    %78 = arith.cmpf oeq, %77, %33 : vector<5x256xf32>
    %cst_36 = arith.constant 7.812500e-03 : f32
    %79 = vector.broadcast %cst_36 : f32 to vector<5x256xf32>
    %80 = arith.cmpf ogt, %33, %79 : vector<5x256xf32>
    %81 = arith.andi %78, %80 : vector<5x256xi1>
    %cst_37 = arith.constant 0.00999999977 : f32
    %82 = vector.broadcast %cst_37 : f32 to vector<5x1xf32>
    %83 = arith.mulf %82, %31 : vector<5x1xf32>
    %84 = vector.broadcast %83 : vector<5x1xf32> to vector<5x256xf32>
    %85 = arith.cmpf ogt, %33, %84 : vector<5x256xf32>
    %86 = arith.andi %81, %85 : vector<5x256xi1>
    %87 = arith.extui %86 : vector<5x256xi1> to vector<5x256xi8>
    %c0_38 = arith.constant 0 : index
    %c0_39 = arith.constant 0 : index
    %c0_40 = arith.constant 0 : index
    %88 = vector.load %arg10[%c0_38, %c0_39, %c0_40] : memref<1x5x256xi8, #tpu.memory_space<vmem>>, vector<1x5x256xi8>
    %89 = vector.shape_cast %88 : vector<1x5x256xi8> to vector<5x256xi8>
    %90 = vector.shape_cast %87 : vector<5x256xi8> to vector<1x5x256xi8>
    tpu.vector_store %arg10[%c0_38, %c0_39, %c0_40], %90 {strides = array<i32>} : memref<1x5x256xi8, #tpu.memory_space<vmem>>, vector<1x5x256xi8>,
    return
  }
  func.func @transform_0(%arg0: i32) -> (i32, i32, i32) {
    %c0_i32 = arith.constant 0 : i32
    %c0_i32_0 = arith.constant 0 : i32
    %c0_i32_1 = arith.constant 0 : i32
    return %arg0, %c0_i32, %c0_i32_0 : i32, i32, i32
  }
  func.func @transform_1(%arg0: i32) -> (i32, i32) {
    %c0_i32 = arith.constant 0 : i32
    %c0_i32_0 = arith.constant 0 : i32
    %c0_i32_1 = arith.constant 0 : i32
    return %c0_i32, %c0_i32_0 : i32, i32
  }
  func.func @transform_2(%arg0: i32) -> (i32, i32) {
    %c0_i32 = arith.constant 0 : i32
    %c0_i32_0 = arith.constant 0 : i32
    %c0_i32_1 = arith.constant 0 : i32
    return %c0_i32, %c0_i32_0 : i32, i32
  }
  func.func @transform_3(%arg0: i32) -> (i32, i32) {
    %c0_i32 = arith.constant 0 : i32
    %c0_i32_0 = arith.constant 0 : i32
    %c0_i32_1 = arith.constant 0 : i32
    return %c0_i32, %c0_i32_0 : i32, i32
  }
  func.func @transform_4(%arg0: i32) -> (i32, i32) {
    %c0_i32 = arith.constant 0 : i32
    %c0_i32_0 = arith.constant 0 : i32
    %c0_i32_1 = arith.constant 0 : i32
    return %c0_i32, %c0_i32_0 : i32, i32
  }
  func.func @transform_5(%arg0: i32) -> (i32, i32) {
    %c0_i32 = arith.constant 0 : i32
    %c0_i32_0 = arith.constant 0 : i32
    %c0_i32_1 = arith.constant 0 : i32
    return %c0_i32, %c0_i32_0 : i32, i32
  }
  func.func @transform_6(%arg0: i32) -> (i32, i32) {
    %c0_i32 = arith.constant 0 : i32
    %c0_i32_0 = arith.constant 0 : i32
    %c0_i32_1 = arith.constant 0 : i32
    return %c0_i32, %c0_i32_0 : i32, i32
  }
  func.func @transform_7(%arg0: i32) -> (i32, i32, i32) {
    %c0_i32 = arith.constant 0 : i32
    %c0_i32_0 = arith.constant 0 : i32
    %c0_i32_1 = arith.constant 0 : i32
    return %arg0, %c0_i32, %c0_i32_0 : i32, i32, i32
  }
  func.func @transform_8(%arg0: i32) -> (i32, i32, i32) {
    %c0_i32 = arith.constant 0 : i32
    %c0_i32_0 = arith.constant 0 : i32
    %c0_i32_1 = arith.constant 0 : i32
    return %arg0, %c0_i32, %c0_i32_0 : i32, i32, i32
  }
  func.func @transform_9(%arg0: i32) -> (i32, i32, i32) {
    %c0_i32 = arith.constant 0 : i32
    %c0_i32_0 = arith.constant 0 : i32
    %c0_i32_1 = arith.constant 0 : i32
    return %arg0, %c0_i32, %c0_i32_0 : i32, i32, i32
  }
}

</mosaic_0001>

<bundles_post_ra>
// kernel: tpu_custom_call.1
= control target key start
LH: loop header
LB: loop body
LE: loop exit
PB: predicated region body
PF: predicated region fallthrough
CT: control target
= control target key end

     0   :  { %s1371_s0 = inlined_call_operand.vmem [shape: f32[2,1,256], index: 0, kind: input, shape index: {}]   ;;  %s1372_s1 = inlined_call_operand.vmem [shape: f32[32,1], index: 1, kind: input, shape index: {}]   ;;  %s1373_s2 = inlined_call_operand.vmem [shape: f32[32,1], index: 2, kind: input, shape index: {}]   ;;  %s1374_s3 = inlined_call_operand.vmem [shape: f32[5,32], index: 3, kind: input, shape index: {}]   ;;  %s1375_s4 = inlined_call_operand.vmem [shape: f32[5,1], index: 4, kind: input, shape index: {}]   ;;  %s1376_s5 = inlined_call_operand.vmem [shape: f32[8,32], index: 5, kind: input, shape index: {}]   ;;  %s1377_s6 = inlined_call_operand.vmem [shape: f32[8,1], index: 6, kind: input, shape index: {}]   ;;  %s1378_s7 = inlined_call_operand.vmem [shape: f32[2,5,256], index: 7, kind: output, shape index: {0}]   ;;  %s1379_s8 = inlined_call_operand.hbm [shape: f32[2,8,256], index: 8, kind: output, shape index: {1}]   ;;  %s1380_s9 = inlined_call_operand.hbm [shape: s8[2,5,256], index: 9, kind: output, shape index: {2}]  }
   0x1   :  { %1381 = sst [smem:[#allocation8_spill]] %s1371_s0 }
   0x2   :  { %1382 = sst [smem:[#allocation9_spill]] %s1372_s1 }
   0x3   :  { %15 = vsyncpa [#allocation3], 0 }
   0x4   :  { %17 = vsyncpa [#allocation3 + $0x1], 0 }
   0x5   :  { %18 = vsyncpa [#allocation5], 0 }
   0x6   :  { %20 = vsyncpa [#allocation5 + $0x1], 0  ;;  %s1141_s30 = smov 0   ;;  %s1143_s10 = smov 0  }
   0x7   :  { %s1145_s11 = smov 0   ;;  %s1147_s12 = smov 0  }
   0x8 LB: > { %s1162_s13 = sadd.s32 4294967295, %s1081_s12   ;;  %s891_s14 = sadd.s32 4294967294, %s1081_s12   ;;  %s1081_s12 = sphi %s1147_s12, %s1394_s12   ;;  %s1077_s11 = sphi %s1145_s11, %s1393_s11   ;;  %s1073_s10 = sphi %s1143_s10, %s1392_s10   ;;  %s1069_s30 = sphi %s1141_s30, %s1391_s30  }
   0x9   : > { %s1166_s15 = sadd.s32 1, %s1081_s12   ;;  %s211_s16 = sadd.s32 1, %s1077_s11 }
   0xa   : > { %s208_s17 = ssub.s32 %s1081_s12, %s1166_s15  ;;  %p221_p0 = scmp.ne.s32.totalorder %s1077_s11, %s1073_s10 }
   0xb   : > { %p209_p1 = scmp.eq.s32.totalorder %s208_s17, 0  ;;  %p222_p2 = scmp.eq.s32.totalorder %s1162_s13, 1 }
   0xc   : > { %p227_p3 = scmp.ne.s32.totalorder %s1073_s10, %s1069_s30  ;;  %p228_p4 = scmp.eq.s32.totalorder %s891_s14, 1 }
   0xd   : > { %s1177_s18 = scalar_select %p209_p1, %s1077_s11, %s211_s16  }
   0xe   : > { %p1179_p5 = por %p222_p2, %p221_p0  ;;  %p1183_p6 = por %p228_p4, %p227_p3 }
   0xf   : > { %p894_p7 = scmp.ge.s32.totalorder %s1081_s12, 1  ;;  %p297_p8 = scmp.lt.s32.totalorder %s1081_s12, 3 }
  0x11   : > { %p298_p9 = pnand %p894_p7, %p297_p8 }
  0x12   : > { %v397_v0 = vld [vmem:[%s1373_s2] sm:$0xff] (!%p298_p9)  ;;  %s1385_s1 = sld [smem:[#allocation9_spill]] (!%p298_p9)  ;;  %v1083_v2 = vmov (!%p298_p9), 0   ;;  %v398_v3 = vld [vmem:[%s1373_s2 + $0x8] sm:$0xff] (!%p298_p9)  ;;  %v400_v7 = vld [vmem:[%s1373_s2 + $0x18] sm:$0xff] (!%p298_p9)  ;;  %v1084_v10 = vmov (!%p298_p9), 0.0   ;;  %v379_v11 = vlaneseq (!%p298_p9) }
  0x13   : > { %301 = sbr.rel (%p298_p9) target bundleno = 1007 (0x3ef), region = 48  ;;  %980 = vset.pattern.permute.xlu1 (!%p298_p9), %v1083_v2  ;;  %979 = vset.pattern.permute.xlu0 (!%p298_p9), %v1083_v2  ;;  %v399_v8 = vld [vmem:[%s1373_s2 + $0x10] sm:$0xff] (!%p298_p9)  ;;  %v438_v9 = vld [vmem:[%s1375_s4] sm:$0x1f] (!%p298_p9)  ;;  %p342_p10 = scmp.lt.s32.totalorder (!%p298_p9), %s1162_s13, 1  ;;  %vm444_vm0 = vcmask (!%p298_p9), 261120  }
  0x14   : > { %403 = vperm.xlu1 (!%p298_p9), %980, %v397_v0   ;;  %512 = vmatprep.mubr.f32.mxu0 (!%p298_p9), %v1084_v10  ;;  %v380_v12 = vshrl.u32 (!%p298_p9), %v379_v11, 7  ;;  %s1386_s0 = sld [smem:[#allocation8_spill]] (!%p298_p9)  ;;  %v437_v54 = vld [vmem:[%s1374_s3] sm:$0x1f] (!%p298_p9)  ;;  %vm602_vm1 = vcmask (!%p298_p9), 1044480   ;;  %s1085_s29 = smov (!%p298_p9), 1  }
  0x15   : > { %593 = vmatprep.mubr.f32.mxu1 (!%p298_p9), %v1084_v10  ;;  %v519_v10 = vld [vmem:[%s1376_s5] sm:$0xff] (!%p298_p9)  ;;  %s1087_s14 = smov (!%p298_p9), 16   ;;  %s1271_s22 = sand.u32 (!%p298_p9), 1, %s1073_s10  }
  0x16   : > { %v381_v13 = vsub.s32 (!%p298_p9), 0, %v380_v12  ;;  %v385_v14 = vsub.s32 (!%p298_p9), 1, %v380_v12  ;;  %s895_s23 = sshll.u32 (!%p298_p9), %s1271_s22, 4  ;;  %s911_s25 = sshll.u32 (!%p298_p9), %s1162_s13, 8 }
  0x17   : > { %s334_s26 = scalar_lea.vmem (!%p298_p9), [#allocation2], %s895_s23  ;;  %s1293_s21 = scalar_lea.hbm (!%p298_p9), %s1379_s8, %s911_s25 }
  0x18   : > { %v354_v1 = vld [vmem:[%s1385_s1] sm:$0xff] (!%p298_p9)  ;;  %v355_v4 = vld [vmem:[%s1385_s1 + $0x8] sm:$0xff] (!%p298_p9)  ;;  %408 = vperm.xlu1 (!%p298_p9), %980, %v398_v3   ;;  %v357_v5 = vld [vmem:[%s1385_s1 + $0x18] sm:$0xff] (!%p298_p9)  ;;  %s739_s25 = scalar_lea.sflag (!%p298_p9), [#allocation3], %s1271_s22  ;;  %s1089_s17 = smov (!%p298_p9), [#allocation2]  }
  0x19   : > { %360 = vperm.xlu0 (!%p298_p9), %979, %v354_v1   ;;  %v356_v6 = vld [vmem:[%s1385_s1 + $0x10] sm:$0xff] (!%p298_p9) }
  0x1a   : > { %s1220_s27 = scalar_select %p342_p10, %s1162_s13, 1 }
  0x1c   : > { %375 = vperm.xlu1 %980, %v357_v5   ;;  %s897_s28 = sshll.u32 %s1220_s27, 1  ;;  %s910_s24 = sshll.u32 %s1220_s27, 4 }
  0x1d   : > { %365 = vperm.xlu0 %979, %v355_v4   ;;  %s345_s16 = scalar_lea.vmem %s1386_s0, %s897_s28  ;;  %s350_s28 = scalar_lea.vmem %s1378_s7, %s910_s24 }
  0x1e   : > { %v353_v15 = vld [vmem:[%s345_s16] sm:$0x3]  ;;  %s1086_s27 = smov 127   ;;  %s1088_s16 = smov 112  }
  0x1f   : > { %v382_v16 = vrot.slane %v353_v15, %v381_v13  ;;  %v386_v17 = vrot.slane %v353_v15, %v385_v14  ;;  %s896_s24 = sshll.u32 %s1271_s22, 2  ;;  %s991_s0 = sshll.u32 %s1089_s17, 4  ;;  %s992_s0 = int_to_ptr.vmem [resolvable:$false] %s991_s0 }
  0x20   : > { %418 = vperm.xlu1 %980, %v400_v7   ;;  %s993_s1 = scalar_lea.vmem %s992_s0, 512 }
  0x21   : > { %370 = vperm.xlu0 %979, %v356_v6  }
  0x25   : > { %413 = vperm.xlu0 %979, %v399_v8  }
  0x29   : > { %441 = vperm.xlu0 %979, %v438_v9  }
  0x93   : > { %v404_v18 = vpop.permute.xlu1 %403 }
  0x97   : > { %v409_v22 = vpop.permute.xlu1 %408 }
  0x98   : > { %v361_v19 = vpop.permute.xlu0 %360 }
  0x99   : > { %v389_v20 = vmul.f32 %v382_v16, %v361_v19  ;;  %v390_v21 = vmul.f32 %v386_v17, %v361_v19 }
  0x9b   : > { %v421_v26 = vadd.f32 %v404_v18, %v389_v20  ;;  %v422_v27 = vadd.f32 %v404_v18, %v390_v21  ;;  %v376_v30 = vpop.permute.xlu1 %375 }
  0x9c   : > { %v366_v23 = vpop.permute.xlu0 %365  ;;  %v395_v36 = vmul.f32 %v382_v16, %v376_v30  ;;  %v396_v37 = vmul.f32 %v386_v17, %v376_v30 }
  0x9d   : > { %v391_v24 = vmul.f32 %v382_v16, %v366_v23  ;;  %v392_v25 = vmul.f32 %v386_v17, %v366_v23  ;;  %v430_v32 = vmax.f32 %v422_v27, 0.0  ;;  %v429_v34 = vmax.f32 %v421_v26, 0.0 }
  0x9f   : > { %v423_v28 = vadd.f32 %v409_v22, %v391_v24  ;;  %v424_v29 = vadd.f32 %v409_v22, %v392_v25  ;;  %v419_v40 = vpop.permute.xlu1 %418 }
  0xa0   : > { %v371_v31 = vpop.permute.xlu0 %370  ;;  %v427_v44 = vadd.f32 %v419_v40, %v395_v36  ;;  %v428_v45 = vadd.f32 %v419_v40, %v396_v37 }
  0xa1   : > { %v432_v33 = vmax.f32 %v424_v29, 0.0  ;;  %v431_v35 = vmax.f32 %v423_v28, 0.0  ;;  %v393_v38 = vmul.f32 %v382_v16, %v371_v31  ;;  %v394_v39 = vmul.f32 %v386_v17, %v371_v31 }
  0xa2   : > { %v435_v48 = vmax.f32 %v427_v44, 0.0  ;;  %v436_v49 = vmax.f32 %v428_v45, 0.0  ;;  %v625_v16 = vand.u32 127, %v379_v11 }
  0xa3   : > { %v913_v42 = vpack.c.bf16 %v432_v33, %v430_v32  ;;  %v915_v43 = vpack.c.bf16 %v431_v35, %v429_v34  ;;  %v520_v35 = vld [vmem:[%s1377_s6] sm:$0xff] }
  0xa4   : > { %v414_v41 = vpop.permute.xlu0 %413  ;;  %v626_v17 = vadd.s32 128, %v625_v16  ;;  %v631_v18 = vand.u32 15, %v625_v16  ;;  %vm657_vm2 = vcmp.lt.s32.totalorder %v625_v16, 1  ;;  %vm668_vm5 = vcmp.lt.s32.totalorder %v625_v16, 127 }
  0xa5   : > { %v425_v46 = vadd.f32 %v414_v41, %v393_v38  ;;  %v426_v47 = vadd.f32 %v414_v41, %v394_v39  ;;  %914 = vmatprep.subr.bf16.mxu0 %v913_v42  ;;  %922 = vmatprep.subr.bf16.mxu1 %v913_v42  ;;  %vm677_vm8 = vcmp.lt.s32.totalorder %v625_v16, 16  ;;  %vm693_vm9 = vcmp.lt.s32.totalorder %v625_v16, 112 }
  0xa6   : > { %916 = vmatpush1.bf16.msra.mxu0 %v915_v43  ;;  %924 = vmatpush1.bf16.msra.mxu1 %v915_v43  ;;  %v638_v19 = vand.u32 15, %v626_v17  ;;  %vm651_vm3 = vcmp.eq.s32.totalorder %v631_v18, 0  ;;  %vm662_vm6 = vcmp.eq.s32.totalorder %v631_v18, 15  ;;  %vm688_vm10 = vcmp.ge.s32.totalorder %v626_v17, 240 }
  0xa7   : > { %v433_v50 = vmax.f32 %v425_v46, 0.0  ;;  %v434_v51 = vmax.f32 %v426_v47, 0.0 }
  0xa8   : > { %v442_v55 = vpop.permute.xlu0 %441  ;;  %vm652_vm4 = vcmp.eq.s32.totalorder %v638_v19, 0  ;;  %vm663_vm7 = vcmp.eq.s32.totalorder %v638_v19, 15 }
  0xa9   : > { %v917_v52 = vpack.c.bf16 %v436_v49, %v434_v51  ;;  %v919_v53 = vpack.c.bf16 %v435_v48, %v433_v50 }
  0xab   : > { %918 = vmatprep.subr.bf16.mxu0 %v917_v52  ;;  %926 = vmatprep.subr.bf16.mxu1 %v917_v52 }
  0xac   : > { %920 = vmatpush1.bf16.msra.mxu0 %v919_v53  ;;  %928 = vmatpush1.bf16.msra.mxu1 %v919_v53 }
  0xaf   : > { %900 = vmatmul.mubr.msk.f32.vlgmr.msra.gmra.mrb[0].mxu0 %vm444_vm0, %v437_v54  ;;  %901 = vmatmul.mubr.msk.f32.vlgmr.msra.gmra.mrb[0].mxu1 %vm444_vm0, %v519_v10 }
 0x182   : > { %v514_v56 = vpop.f32.mrb[0].mxu0  ;;  %v595_v36 = vpop.f32.mrb[0].mxu1 }
 0x183   : > { %v515_v57 = vadd.f32 %v514_v56, %v442_v55  ;;  %v516_v58 = vpop.f32.mrb[1].mxu0  ;;  %v597_v37 = vpop.f32.mrb[1].mxu1 }
 0x184   : > { %v517_v59 = vadd.f32 %v516_v58, %v442_v55 }
 0x185   : > { %v603_v60 = vsel %vm602_vm1, %v515_v57, -inf }
 0x186   : > { %v604_v61 = vsel %vm602_vm1, %v517_v59, -inf }
 0x187   : > { %v605_v62 = vmax.f32 %v603_v60, %v604_v61 }
 0x189   : > { %606 = vmax.xlane.f32.xlu1 %v605_v62 }
 0x216   : > { %v607_v63 = vpop.xlane.xlu1 %606 }
 0x217   : > { %v608_v0 = vsub.f32 %v515_v57, %v607_v63  ;;  %v609_v1 = vsub.f32 %v517_v59, %v607_v63 }
 0x219   : > { %v610_v3 = vmul.f32 1.442695, %v608_v0  ;;  %v612_v4 = vmul.f32 1.442695, %v609_v1 }
 0x21b   : > { %981 = vpow2.f32 %v610_v3 }
 0x21c   : > { %983 = vpow2.f32 %v612_v4 }
 0x225   : > { %v982_v5 = vpop.eup %981 }
 0x226   : > { %v984_v6 = vpop.eup %983  ;;  %v614_v7 = vsel %vm602_vm1, %v982_v5, 0.0 }
 0x227   : > { %v615_v8 = vsel %vm602_vm1, %v984_v6, 0.0 }
 0x228   : > { %v616_v9 = vadd.f32 %v615_v8, %v614_v7 }
 0x22a   : > { %617 = vadd.xlane.f32.xlu0 %v616_v9 }
 0x2b7   : > { %v618_v12 = vpop.xlane.xlu0 %617 }
 0x2b8   : > { %985 = vrcp.f32 %v618_v12 }
 0x2c2   : > { %v1240_v13 = vpop.eup %985 }
 0x2c3   : > { %v1246_v14 = vmul.f32 %v1240_v13, %v984_v6  ;;  %v1249_v15 = vmul.f32 %v1240_v13, %v982_v5  ;;  %v708_v49 = vmul.f32 0.01, %v1240_v13 }
 0x2c5   : > { %655 = vrot.lane.b32.xlu1 %v1246_v14, %s1085_s29  ;;  %623 = vst [vmem:[%s350_s28 + $0x8] sm:$0x1f] %v1246_v14  ;;  %653 = vrot.lane.b32.xlu0 %v1249_v15, %s1085_s29  ;;  %622 = vst [vmem:[%s350_s28] sm:$0x1f] %v1249_v15  ;;  %vm704_vm12 = vcmp.gt.f32.partialorder %v1249_v15, 0.0078125  ;;  %vm705_vm13 = vcmp.gt.f32.partialorder %v1246_v14, 0.0078125  ;;  %vm709_vm1 = vcmp.gt.f32.partialorder %v1249_v15, %v708_v49  ;;  %s761_s28 = sshll.u32 %s334_s26, 4  ;;  %s1300_s28 = int_to_ptr.vmem [resolvable:$true] %s761_s28 }
 0x2c6   : > { %s912_s29 = sshll.u32 %s1162_s13, 6  ;;  %p994_p0 = scmp.lt.s32.totalorder %s1300_s28, %s992_s0 }
 0x2c9   : > { %664 = vrot.lane.b32.xlu1 %v1249_v15, %s1086_s27  ;;  %666 = vrot.lane.b32.xlu0 %v1246_v14, %s1086_s27  ;;  %s1287_s27 = scalar_lea.vmem [#allocation4], %s896_s24  ;;  %s1305_s24 = scalar_lea.hbm %s1380_s9, %s912_s29 }
 0x2ca   : > { %v730_v60 = vld [vmem:[%s1287_s27] sm:$0xf] }
 0x337   : > { %v656_v20 = vpop.permute.xlu1 %655  ;;  %v654_v21 = vpop.permute.xlu0 %653 }
 0x338   : > { %v658_v22 = vsel %vm657_vm2, %v654_v21, %v656_v20  ;;  %v659_v23 = vsel %vm657_vm2, %v656_v20, %v654_v21  ;;  %vm710_vm2 = vcmp.gt.f32.partialorder %v1246_v14, %v708_v49 }
 0x339   : > { %v660_v24 = vsel %vm651_vm3, -inf, %v659_v23  ;;  %v661_v25 = vsel %vm652_vm4, -inf, %v658_v22 }
 0x33a   : > { %v673_v28 = vmax.f32 %v1249_v15, %v660_v24  ;;  %v674_v11 = vmax.f32 %v1246_v14, %v661_v25 }
 0x33b   : > { %v665_v26 = vpop.permute.xlu1 %664  ;;  %v667_v27 = vpop.permute.xlu0 %666 }
 0x33c   : > { %v669_v29 = vsel %vm668_vm5, %v665_v26, %v667_v27  ;;  %v670_v30 = vsel %vm668_vm5, %v667_v27, %v665_v26 }
 0x33d   : > { %v671_v31 = vsel %vm662_vm6, -inf, %v669_v29  ;;  %v672_v32 = vsel %vm663_vm7, -inf, %v670_v30  ;;  %vm723_vm7 = vcmask 1041408  }
 0x33e   : > { %v675_v33 = vmax.f32 %v673_v28, %v671_v31  ;;  %v676_v34 = vmax.f32 %v674_v11, %v672_v32 }
 0x340   : > { %681 = vrot.lane.b32.xlu0 %v676_v34, %s1087_s14  ;;  %679 = vrot.lane.b32.xlu1 %v675_v33, %s1087_s14  ;;  %s775_s14 = sshll.u32 %s1287_s27, 4  ;;  %s1307_s14 = int_to_ptr.vmem [resolvable:$true] %s775_s14 }
 0x344   : > { %691 = vrot.lane.b32.xlu0 %v676_v34, %s1088_s16  ;;  %689 = vrot.lane.b32.xlu1 %v675_v33, %s1088_s16  ;;  %s987_s16 = scalar_lea.vmem %s1300_s28, 256 }
 0x345   : > { %p988_p11 = scmp.ne.s32.totalorder %s1300_s28, %s987_s16  ;;  %p995_p1 = scmp.lt.s32.totalorder %s993_s1, %s987_s16 }
 0x347   : > { %p989_p12 = pnand %p988_p11, %p1179_p5  ;;  %p996_p2 = por %p995_p1, %p994_p0 }
 0x348   : > { %523 = vperm.xlu1 %980, %v520_v35  }
 0x349   : > { %p990_p13 = pneg %p989_p12 }
 0x34b   : > { %p997_p3 = pnand %p996_p2, %p990_p13 }
 0x3b2   : > { %v682_v38 = vpop.permute.xlu0 %681  ;;  %v680_v39 = vpop.permute.xlu1 %679 }
 0x3b3   : > { %v684_v40 = vsel %vm677_vm8, %v682_v38, %v680_v39  ;;  %v683_v41 = vsel %vm677_vm8, %v680_v39, %v682_v38 }
 0x3b4   : > { %v685_v42 = vsel %vm677_vm8, -inf, %v684_v40  ;;  %v699_v46 = vmax.f32 %v676_v34, %v683_v41  ;;  %vm724_vm8 = vsmask.f32 1024 }
 0x3b5   : > { %v698_v43 = vmax.f32 %v675_v33, %v685_v42 }
 0x3b6   : > { %v692_v44 = vpop.permute.xlu0 %691  ;;  %v690_v45 = vpop.permute.xlu1 %689 }
 0x3b7   : > { %v694_v47 = vsel %vm693_vm9, %v690_v45, %v692_v44  ;;  %v695_v48 = vsel %vm693_vm9, %v692_v44, %v690_v45 }
 0x3b8   : > { %v697_v50 = vsel %vm688_vm10, -inf, %v695_v48  ;;  %v700_v51 = vmax.f32 %v698_v43, %v694_v47  ;;  %vm726_vm10 = vcmask 1043458  }
 0x3b9   : > { %v701_v52 = vmax.f32 %v699_v46, %v697_v50 }
 0x3ba   : > { %vm702_vm11 = vcmp.eq.f32.partialorder %v700_v51, %v1249_v15 }
 0x3bb   : > { %vm703_vm14 = vcmp.eq.f32.partialorder %v701_v52, %v1246_v14  ;;  %vm706_vm15 = vmand %vm702_vm11, %vm704_vm12  ;;  %vm727_vm11 = vsmask.f32 3072 }
 0x3bc   : > { %vm707_vm0 = vmand %vm703_vm14, %vm705_vm13 }
 0x3bd   : > { %vm711_vm3 = vmand %vm706_vm15, %vm709_vm1 }
 0x3be   : > { %vm712_vm4 = vmand %vm707_vm0, %vm710_vm2 }
 0x3bf   : > { %vm713_vm5 = vmpackc.low %vm711_vm3, %vm711_vm3 }
 0x3c0   : > { %vm714_vm6 = vmpackc.even %vm713_vm5, %vm713_vm5 }
 0x3c1   : > { %vm715_vm9 = vmpackc.low %vm712_vm4, %vm712_vm4  ;;  %v717_v53 = vsel %vm714_vm6, 16843009, %v1083_v2 }
 0x3c2   : > { %vm716_vm12 = vmpackc.even %vm715_vm9, %vm715_vm9  ;;  %v719_v54 = vunpack.c.0.s8 %v717_v53 }
 0x3c3   : > { %v718_v55 = vsel %vm716_vm12, 16843009, %v1083_v2  ;;  %vm1277_vm13 = vmand %vm723_vm7, %vm724_vm8 }
 0x3c4   : > { %v720_v57 = vunpack.c.0.s8 %v718_v55  ;;  %vm1282_vm14 = vmand %vm726_vm10, %vm727_vm11 }
 0x3c5   : > { %vm729_vm15 = vmor %vm1282_vm14, %vm1277_vm13 }
 0x3c6   : > { %v721_v59 = vpack.c.b16 %v720_v57, %v719_v54 }
 0x3c7   : > { %v524_v2 = vpop.permute.xlu1 %523 }
 0x3c8   : > { %v596_v61 = vadd.f32 %v595_v36, %v524_v2  ;;  %v598_v62 = vadd.f32 %v597_v37, %v524_v2  ;;  %v722_v63 = vpack.c.b8 %v721_v59, %v721_v59 }
 0x3ca   : > { %600 = vst [vmem:[%s334_s26] sm:$0xff] %v596_v61  ;;  %601 = vst [vmem:[%s334_s26 + $0x8] sm:$0xff] %v598_v62  ;;  %v731_v0 = vsel %vm729_vm15, %v722_v63, %v730_v60 }
 0x3cb   : > { %1000 = shalt.err (!%p997_p3)
}
 0x3cc   : > { %s1001_s26 = scalar_lea.hbm %s1293_s21, 256  ;;  %s1005_s23 = scalar_lea.hbm %s1379_s8, 512 }
 0x3cd   : > { %p1002_p4 = scmp.ne.s32.totalorder %s1293_s21, %s1001_s26  ;;  %p1006_p9 = scmp.lt.u32.totalorder %s1293_s21, %s1379_s8 }
 0x3ce   : > { %p1007_p10 = scmp.lt.u32.totalorder %s1005_s23, %s1001_s26  ;;  %p1009_p12 = scmp.lt.u32.totalorder %s1001_s26, %s1293_s21 }
 0x3cf   : > { %p1003_p7 = pnand %p1002_p4, %p1179_p5 }
 0x3d0   : > { %p1008_p11 = por %p1007_p10, %p1006_p9 }
 0x3d1   : > { %p1004_p8 = pneg %p1003_p7 }
 0x3d2   : > { %p1010_p13 = por %p1009_p12, %p1008_p11 }
 0x3d4   : > { %p1011_p0 = pnand %p1010_p13, %p1004_p8 }
 0x3d6   : > { %1014 = shalt.err (!%p1011_p0)
}
 0x3d7   : > { %929 = dma.vmem_to_hbm [thread:$0]  (%p1179_p5), %s1300_s28, 256, %s1293_s21, %s739_s25   ;;  %732 = vst [vmem:[%s1287_s27] sm:$0xf] %v731_v0 }
 0x3d8   : > { %s744_s1 = scalar_lea.sflag [#allocation5], %s1271_s22  ;;  %s1015_s16 = scalar_lea.vmem %s1307_s14, 64 }
 0x3d9   : > { %p1016_p1 = scmp.ne.s32.totalorder %s1307_s14, %s1015_s16  ;;  %s1090_s26 = smov [#allocation4]  }
 0x3da   : > { %s1019_s29 = sshll.u32 %s1090_s26, 4  ;;  %s1020_s29 = int_to_ptr.vmem [resolvable:$false] %s1019_s29 }
 0x3db   : > { %p1017_p2 = pnand %p1016_p1, %p1179_p5  ;;  %s1021_s13 = scalar_lea.vmem %s1020_s29, 128 }
 0x3dc   : > { %p1022_p4 = scmp.lt.s32.totalorder %s1307_s14, %s1020_s29  ;;  %p1023_p7 = scmp.lt.s32.totalorder %s1021_s13, %s1015_s16 }
 0x3dd   : > { %p1018_p3 = pneg %p1017_p2 }
 0x3de   : > { %p1024_p8 = por %p1023_p7, %p1022_p4 }
 0x3e0   : > { %p1025_p9 = pnand %p1024_p8, %p1018_p3 }
 0x3e2   : > { %1028 = shalt.err (!%p1025_p9)
}
 0x3e3   : > { %s1029_s22 = scalar_lea.hbm %s1305_s24, 64  ;;  %s1033_s21 = scalar_lea.hbm %s1380_s9, 128 }
 0x3e4   : > { %p1030_p10 = scmp.ne.s32.totalorder %s1305_s24, %s1029_s22  ;;  %p1034_p13 = scmp.lt.u32.totalorder %s1305_s24, %s1380_s9 }
 0x3e5   : > { %p1035_p0 = scmp.lt.u32.totalorder %s1033_s21, %s1029_s22  ;;  %p1037_p2 = scmp.lt.u32.totalorder %s1029_s22, %s1305_s24 }
 0x3e6   : > { %p1031_p11 = pnand %p1030_p10, %p1179_p5 }
 0x3e7   : > { %p1036_p1 = por %p1035_p0, %p1034_p13 }
 0x3e8   : > { %p1032_p12 = pneg %p1031_p11 }
 0x3e9   : > { %p1038_p3 = por %p1037_p2, %p1036_p1 }
 0x3eb   : > { %p1039_p4 = pnand %p1038_p3, %p1032_p12 }
 0x3ed   : > { %1042 = shalt.err (!%p1039_p4)
}
 0x3ee   : > { %930 = dma.vmem_to_hbm [thread:$0]  (%p1179_p5), %s1307_s14, 64, %s1305_s24, %s744_s1  }
 0x3ef PF: > { %p940_p7 = scmp.ge.s32.totalorder %s1081_s12, 2  ;;  %s795_s17 = sand.u32 1, %s1069_s30  }
 0x3f0   : > { %s796_s0 = scalar_lea.sflag [#allocation3], %s795_s17 }
 0x3f1   : > { %p934_p8 = pnand %p940_p7, %p1183_p6 }
 0x3f3   : > { %1060 = dma.done.wait (!%p934_p8), %s796_s0, 256  }
 0x3f4   : > { %1062 = vsyncadd (!%p934_p8), %s796_s0, 4294967040  ;;  %s805_s16 = scalar_lea.sflag [#allocation5], %s795_s17 }
 0x3f5   : > { %1064 = dma.done.wait (!%p934_p8), %s805_s16, 64  }
 0x3f6   : > { %1066 = vsyncadd (!%p934_p8), %s805_s16, 4294967232  ;;  %p23_p5 = scmp.ge.s32.totalorder %s1166_s15, 4   ;;  %s1391_s30 = smov %s1073_s10 }
 0x3f7   : > { %s1392_s10 = smov %s1077_s11  ;;  %s1393_s11 = smov %s1177_s18 }
 0x3f8   : > { %s1394_s12 = smov %s1166_s15  ;;  %25 = sbr.rel (!%p23_p5) target bundleno = 8 (0x8), region = 112 }
 0x3ff   :  { %810 = vsyncpa [#allocation3], 1 }
 0x400   :  { %812 = vsyncpa [#allocation3 + $0x1], 1 }
 0x401   :  { %813 = vsyncpa [#allocation5], 1 }
 0x402   :  { %815 = vsyncpa [#allocation5 + $0x1], 1 }

</bundles_post_ra>
